<compile_context>
chip_gen: v7x
topology: tpu7x:2x2x1
jax: 0.10.0
libtpu: 0.0.40
codegen_flags: <defaults>
</compile_context>

<pallas_src>
import jax
import jax.numpy as jnp
from jax.experimental import pallas as pl
from jax.experimental.pallas import tpu as pltpu


def _round_up(x, m):
    return (x + m - 1) // m * m


def _lfm_kernel(feat_ref, w_ref, fcb_ref, bias_ref, out_ref):
    # feat_ref: [TB, dim] VMEM (streamed), w_ref: [1, dim] VMEM (resident),
    # fcb_ref: [1, 1] SMEM scalar, bias_ref / out_ref: [1, TB] VMEM (lane-dense).
    feat = feat_ref[...].astype(jnp.float32)
    w = w_ref[...].astype(jnp.float32)

    # Lane-dense linear layer: contract the feature (lane) axis of both operands
    # ("NT" dot, same pattern as q @ k^T in flash attention) -> [1, TB].
    score = jax.lax.dot_general(
        w, feat,
        dimension_numbers=(((1,), (1,)), ((), ())),
        preferred_element_type=jnp.float32,
    ) + fcb_ref[0, 0]

    # rescale_sigmoid(score, 1, 5) = 1 + 4 * sigmoid(score); exp + approx reciprocal
    # both run on the EUP slot, keeping VALU slots free.
    sig = pl.reciprocal(1.0 + jnp.exp(-score), approx=True)
    out_ref[...] = (1.0 + sig * 4.0 + bias_ref[...]).astype(out_ref.dtype)


def lfm_forward(feature, user_id, item_id, fc_w, fc_b, b_users, b_items, *, tb=None):
    """feature: [B, dim]; user_id/item_id: [B] int; fc_w: [1, dim]; fc_b: [1];
    b_users: [user_num, 1]; b_items: [item_num, 1].  Returns [B, 1] float32."""
    B, dim = feature.shape

    if tb is None:
        # Keep the double-buffered feature tile (2 * tb * dim * 4 B) <= ~8 MiB so it
        # fits every generation's scoped-VMEM default with headroom (v5e 16 MiB,
        # v6e 32 MiB, v7x 32 MiB of 64 MiB physical).
        cap = max(128, (8 * 1024 * 1024 // (2 * 4 * dim)) // 128 * 128)
        tb = min(2048, cap, _round_up(B, 128))
    b_pad = _round_up(B, tb)

    # Plain-JAX glue: data-dependent gathers, bias combination (post-sigmoid additive
    # term), lane-dense layout, and padding to the tile boundary.
    bias = (b_users[user_id] + b_items[item_id]).reshape(1, B).astype(jnp.float32)
    if b_pad != B:
        feature = jnp.pad(feature, ((0, b_pad - B), (0, 0)))
        bias = jnp.pad(bias, ((0, 0), (0, b_pad - B)))
    fcb = fc_b.reshape(1, 1).astype(jnp.float32)

    out = pl.pallas_call(
        _lfm_kernel,
        out_shape=jax.ShapeDtypeStruct((1, b_pad), jnp.float32),
        grid_spec=pl.GridSpec(
            grid=(b_pad // tb,),
            in_specs=[
                pl.BlockSpec((tb, dim), lambda i: (i, 0)),            # feature (streamed)
                pl.BlockSpec((1, dim), lambda i: (0, 0)),             # fc weight (resident)
                pl.BlockSpec(memory_space=pltpu.MemorySpace.SMEM),    # fc bias scalar
                pl.BlockSpec((1, tb), lambda i: (0, i)),              # combined user+item bias
            ],
            out_specs=pl.BlockSpec((1, tb), lambda i: (0, i)),        # lane-dense output row
        ),
        compiler_params=pltpu.CompilerParams(
            dimension_semantics=("parallel",),
            vmem_limit_bytes=32 * 1024 * 1024,
        ),
        cost_estimate=pl.CostEstimate(
            flops=2 * b_pad * dim,
            transcendentals=b_pad,
            bytes_accessed=b_pad * dim * 4 + 3 * b_pad * 4 + dim * 4,
        ),
    )(feature, fc_w, fcb, bias)

    return out[:, :B].reshape(B, 1)


def init_params(key, dim, user_num, item_num):
    k1, k2, k3, k4 = jax.random.split(key, 4)
    # Matches LFM.init_weight(): uniform ranges.
    fc_w = jax.random.uniform(k1, (1, dim), jnp.float32, minval=-0.1, maxval=0.1)
    fc_b = jax.random.uniform(k2, (1,), jnp.float32, minval=0.5, maxval=1.5)
    b_users = jax.random.uniform(k3, (user_num, 1), jnp.float32, minval=0.5, maxval=1.5)
    b_items = jax.random.uniform(k4, (item_num, 1), jnp.float32, minval=0.5, maxval=1.5)
    return fc_w, fc_b, b_users, b_items


if __name__ == "__main__":
    dim, user_num, item_num = 32, 16, 12
    B = 8

    key = jax.random.PRNGKey(0)
    kp, kf, ku, ki = jax.random.split(key, 4)

    fc_w, fc_b, b_users, b_items = init_params(kp, dim, user_num, item_num)

    feature = jax.random.normal(kf, (B, dim), jnp.float32)
    user_id = jax.random.randint(ku, (B,), 0, user_num, jnp.int32)
    item_id = jax.random.randint(ki, (B,), 0, item_num, jnp.int32)

    out = lfm_forward(feature, user_id, item_id, fc_w, fc_b, b_users, b_items)
    out = jax.block_until_ready(out)

    # Pure-JAX reference check.
    score = feature @ fc_w.T + fc_b                      # [B, 1]
    ref = 1.0 + jax.nn.sigmoid(score) * 4.0
    ref = ref + b_users[user_id] + b_items[item_id]
    assert out.shape == (B, 1)
    # Tolerance accounts for the EUP approximate reciprocal used for the sigmoid.
    assert jnp.allclose(out, ref, atol=1e-2, rtol=1e-2), float(jnp.max(jnp.abs(out - ref)))

    print("KERNEL_OK")
</pallas_src>

<mosaic_0001>
module attributes {stable_mosaic.version = 11 : i64} {
  func.func @_lfm_kernel(%arg0: i32, %arg1: memref<128x32xf32, #tpu.memory_space<vmem>>, %arg2: memref<1x32xf32, #tpu.memory_space<vmem>>, %arg3: memref<1x1xf32, #tpu.memory_space<smem>>, %arg4: memref<1x128xf32, #tpu.memory_space<vmem>>, %arg5: memref<1x128xf32, #tpu.memory_space<vmem>>) attributes {dimension_semantics = [#tpu.dimension_semantics<parallel>], iteration_bounds = array<i64: 1>, scalar_prefetch = 0 : i64, scratch_operands = 0 : i64, tpu.core_type = #tpu.core_type<tc>, window_params = [{transform_indices = @transform_0, window_bounds = array<i64: 128, 32>}, {pipeline_mode = #tpu.pipeline_mode<synchronous>, transform_indices = @transform_1, window_bounds = array<i64: 1, 32>}, {transform_indices = @transform_2, window_bounds = array<i64: 1, 1>}, {transform_indices = @transform_3, window_bounds = array<i64: 1, 128>}, {transform_indices = @transform_4, window_bounds = array<i64: 1, 128>}]} {
    %c0 = arith.constant 0 : index
    %c0_0 = arith.constant 0 : index
    %0 = vector.load %arg1[%c0, %c0_0] : memref<128x32xf32, #tpu.memory_space<vmem>>, vector<128x32xf32>
    %c0_1 = arith.constant 0 : index
    %c0_2 = arith.constant 0 : index
    %1 = vector.load %arg2[%c0_1, %c0_2] : memref<1x32xf32, #tpu.memory_space<vmem>>, vector<1x32xf32>
    %cst = arith.constant dense<0.000000e+00> : vector<1x128xf32>
    %2 = tpu.matmul %1, %0, %cst {dimension_numbers = #tpu.dot_dimension_numbers<[1], [1], [0], [0], [0, 0, 1, 0], [], []>} : vector<1x32xf32>, vector<128x32xf32>, vector<1x128xf32> -> vector<1x128xf32>
    %c0_3 = arith.constant 0 : index
    %c0_4 = arith.constant 0 : index
    %3 = memref.load %arg3[%c0_3, %c0_4] : memref<1x1xf32, #tpu.memory_space<smem>>
    %4 = vector.broadcast %3 : f32 to vector<1x128xf32>
    %5 = arith.addf %2, %4 : vector<1x128xf32>
    %cst_5 = arith.constant 0.000000e+00 : f32
    %6 = vector.broadcast %cst_5 : f32 to vector<1x128xf32>
    %7 = arith.subf %6, %5 : vector<1x128xf32>
    %8 = math.exp %7 : vector<1x128xf32>
    %cst_6 = arith.constant 1.000000e+00 : f32
    %9 = vector.broadcast %cst_6 : f32 to vector<1x128xf32>
    %10 = arith.addf %9, %8 : vector<1x128xf32>
    %11 = tpu.reciprocal %10 {approx = true} : vector<1x128xf32> -> vector<1x128xf32>
    %cst_7 = arith.constant 4.000000e+00 : f32
    %12 = vector.broadcast %cst_7 : f32 to vector<1x128xf32>
    %13 = arith.mulf %11, %12 : vector<1x128xf32>
    %cst_8 = arith.constant 1.000000e+00 : f32
    %14 = vector.broadcast %cst_8 : f32 to vector<1x128xf32>
    %15 = arith.addf %14, %13 : vector<1x128xf32>
    %c0_9 = arith.constant 0 : index
    %c0_10 = arith.constant 0 : index
    %16 = vector.load %arg4[%c0_9, %c0_10] : memref<1x128xf32, #tpu.memory_space<vmem>>, vector<1x128xf32>
    %17 = arith.addf %15, %16 : vector<1x128xf32>
    %c0_11 = arith.constant 0 : index
    %c0_12 = arith.constant 0 : index
    %18 = vector.load %arg5[%c0_11, %c0_12] : memref<1x128xf32, #tpu.memory_space<vmem>>, vector<1x128xf32>
    tpu.vector_store %arg5[%c0_11, %c0_12], %17 {strides = array<i32>} : memref<1x128xf32, #tpu.memory_space<vmem>>, vector<1x128xf32>,
    return
  }
  func.func @transform_0(%arg0: i32) -> (i32, i32) {
    %c0_i32 = arith.constant 0 : i32
    %c0_i32_0 = arith.constant 0 : i32
    return %arg0, %c0_i32 : i32, i32
  }
  func.func @transform_1(%arg0: i32) -> (i32, i32) {
    %c0_i32 = arith.constant 0 : i32
    %c0_i32_0 = arith.constant 0 : i32
    %c0_i32_1 = arith.constant 0 : i32
    return %c0_i32, %c0_i32_0 : i32, i32
  }
  func.func @transform_2(%arg0: i32) -> (i32, i32) {
    %c0_i32 = arith.constant 0 : i32
    %c0_i32_0 = arith.constant 0 : i32
    %c0_i32_1 = arith.constant 0 : i32
    return %c0_i32, %c0_i32_0 : i32, i32
  }
  func.func @transform_3(%arg0: i32) -> (i32, i32) {
    %c0_i32 = arith.constant 0 : i32
    %c0_i32_0 = arith.constant 0 : i32
    return %c0_i32, %arg0 : i32, i32
  }
  func.func @transform_4(%arg0: i32) -> (i32, i32) {
    %c0_i32 = arith.constant 0 : i32
    %c0_i32_0 = arith.constant 0 : i32
    return %c0_i32, %arg0 : i32, i32
  }
}

</mosaic_0001>

<bundles_post_ra>
// kernel: tpu_custom_call.1
= control target key start
LH: loop header
LB: loop body
LE: loop exit
PB: predicated region body
PF: predicated region fallthrough
CT: control target
= control target key end

     0   :  { %vm38_vm0 = vcmask 261120   ;;  %v317_v2 = vmov 0.0|0.0   ;;  %vm318_vm2 = vmmov 0   ;;  %v319_v5 = vmov 0.0   ;;  %s438_s0 = inlined_call_operand.vmem [shape: f32[128,32], index: 0, kind: input, shape index: {}]   ;;  %s439_s1 = inlined_call_operand.vmem [shape: f32[1,32], index: 1, kind: input, shape index: {}]   ;;  %s440_s2 = inlined_call_operand.<no memory space> [shape: f32[1,1], index: 2, kind: input, shape index: {}]   ;;  %s441_s3 = inlined_call_operand.vmem [shape: f32[1,128], index: 3, kind: input, shape index: {}]   ;;  %s442_s4 = inlined_call_operand.hbm [shape: f32[1,128], index: 4, kind: output, shape index: {}]  }
   0x1   :  { %v19_v0 = vld [vmem:[%s438_s0] sm:$0xff]  ;;  %v20_v1 = vld [vmem:[%s438_s0 + $0x8] sm:$0xff]  ;;  %253 = vmatprep.subr.bf16.mxu0 %v317_v2  ;;  %vm354_vm1 = vmpackc.low %vm38_vm0, %vm38_vm0  ;;  %250 = vmatprep.mubr.msk.f32.mxu0 %vm318_vm2, %v319_v5 }
   0x2   :  { %v254_v3 = vpack.c.bf16 %v20_v1, %v19_v0  ;;  %v21_v6 = vld [vmem:[%s438_s0 + $0x10] sm:$0xff]  ;;  %v22_v7 = vld [vmem:[%s438_s0 + $0x18] sm:$0xff] }
   0x4   :  { %256 = vmatpush3.bf16.xpose.msk.msra.mxu0 %vm354_vm1, %v254_v3 }
   0x5   :  { %257 = vmatprep.subr.bf16.mxu0 %v317_v2 }
   0x6   :  { %10 = vsyncpa [#allocation4], 0  ;;  %v258_v8 = vpack.c.bf16 %v22_v7, %v21_v6  ;;  %v23_v9 = vld [vmem:[%s438_s0 + $0x20] sm:$0xff]  ;;  %v24_v10 = vld [vmem:[%s438_s0 + $0x28] sm:$0xff]  ;;  %v37_v28 = vstv %s440_s2 }
   0x7   :  { %v262_v11 = vpack.c.bf16 %v24_v10, %v23_v9  ;;  %v25_v12 = vld [vmem:[%s438_s0 + $0x30] sm:$0xff]  ;;  %v26_v13 = vld [vmem:[%s438_s0 + $0x38] sm:$0xff]  ;;  %v27_v15 = vld [vmem:[%s438_s0 + $0x40] sm:$0xff] }
   0x8   :  { %v266_v14 = vpack.c.bf16 %v26_v13, %v25_v12  ;;  %v28_v16 = vld [vmem:[%s438_s0 + $0x48] sm:$0xff]  ;;  %v29_v18 = vld [vmem:[%s438_s0 + $0x50] sm:$0xff]  ;;  %v30_v19 = vld [vmem:[%s438_s0 + $0x58] sm:$0xff] }
   0x9   :  { %v270_v17 = vpack.c.bf16 %v28_v16, %v27_v15  ;;  %v274_v20 = vpack.c.bf16 %v30_v19, %v29_v18  ;;  %v31_v21 = vld [vmem:[%s438_s0 + $0x60] sm:$0xff]  ;;  %v32_v22 = vld [vmem:[%s438_s0 + $0x68] sm:$0xff]  ;;  %v33_v24 = vld [vmem:[%s438_s0 + $0x70] sm:$0xff] }
   0xa   :  { %v278_v23 = vpack.c.bf16 %v32_v22, %v31_v21  ;;  %v34_v25 = vld [vmem:[%s438_s0 + $0x78] sm:$0xff]  ;;  %v35_v27 = vld [vmem:[%s439_s1] sm:$0x1]  ;;  %s320_s1 = smov [#allocation3]  }
   0xb   :  { %v282_v26 = vpack.c.bf16 %v34_v25, %v33_v24  ;;  %v167_v38 = vld [vmem:[%s441_s3] sm:$0x1]  ;;  %s176_s26 = sshll.u32 %s320_s1, 4  ;;  %s177_s26 = int_to_ptr.vmem [resolvable:$true] %s176_s26 }
   0xc   :  { %260 = vmatpush3.bf16.xpose.msk.msra.mxu0 %vm354_vm1, %v258_v8  ;;  %s293_s2 = scalar_lea.vmem %s177_s26, 16  ;;  %s297_s27 = scalar_lea.vmem %s177_s26, 32 }
   0xd   :  { %261 = vmatprep.subr.bf16.mxu0 %v317_v2  ;;  %p294_p0 = scmp.ne.s32.totalorder %s177_s26, %s293_s2  ;;  %p298_p1 = scmp.lt.s32.totalorder %s177_s26, %s177_s26 }
   0xe   :  { %p299_p2 = scmp.lt.s32.totalorder %s297_s27, %s293_s2 }
  0x10   :  { %p300_p3 = por %p299_p2, %p298_p1 }
  0x12   :  { %p301_p4 = pnand %p300_p3, %p294_p0 }
  0x14   :  { %264 = vmatpush3.bf16.xpose.msk.msra.mxu0 %vm354_vm1, %v262_v11 }
  0x15   :  { %265 = vmatprep.subr.bf16.mxu0 %v317_v2 }
  0x1c   :  { %268 = vmatpush3.bf16.xpose.msk.msra.mxu0 %vm354_vm1, %v266_v14 }
  0x1d   :  { %269 = vmatprep.subr.bf16.mxu0 %v317_v2 }
  0x24   :  { %272 = vmatpush3.bf16.xpose.msk.msra.mxu0 %vm354_vm1, %v270_v17 }
  0x25   :  { %273 = vmatprep.subr.bf16.mxu0 %v317_v2 }
  0x2c   :  { %276 = vmatpush3.bf16.xpose.msk.msra.mxu0 %vm354_vm1, %v274_v20 }
  0x2d   :  { %277 = vmatprep.subr.bf16.mxu0 %v317_v2 }
  0x34   :  { %280 = vmatpush3.bf16.xpose.msk.msra.mxu0 %vm354_vm1, %v278_v23 }
  0x35   :  { %281 = vmatprep.subr.bf16.mxu0 %v317_v2 }
  0x3c   :  { %284 = vmatpush3.bf16.xpose.msk.msra.mxu0 %vm354_vm1, %v282_v26 }
  0x43   :  { %251 = vmatmul.mubr.msk.f32.vlgmr.msra.gmra.mrb[0].mxu0 %vm38_vm0, %v35_v27 }
 0x116   :  { %v156_v29 = vpop.f32.mrb[0].mxu0 }
 0x117   :  { %v157_v30 = vadd.f32 %v156_v29, %v37_v28  ;;  %v252_v31 = vpop.f32.mrb[1].mxu0 }
 0x119   :  { %v160_v32 = vsub.f32 0.0, %v157_v30 }
 0x11b   :  { %v161_v33 = vmul.f32 1.442695, %v160_v32 }
 0x11d   :  { %289 = vpow2.f32 %v161_v33 }
 0x127   :  { %v290_v34 = vpop.eup %289 }
 0x128   :  { %v163_v35 = vadd.f32 1.0, %v290_v34 }
 0x12a   :  { %291 = vrcp.f32 %v163_v35 }
 0x134   :  { %v292_v36 = vpop.eup %291 }
 0x135   :  { %v165_v37 = vmul.f32 4.0, %v292_v36 }
 0x137   :  { %v166_v39 = vadd.f32 1.0, %v165_v37 }
 0x139   :  { %v168_v40 = vadd.f32 %v167_v38, %v166_v39 }
 0x13b   :  { %169 = vst [vmem:[#allocation3] sm:$0x1] %v168_v40 }
 0x13c   :  { %304 = shalt.err (!%p301_p4)
}
 0x13d   :  { %s305_s30 = scalar_lea.hbm %s442_s4, 16 }
 0x13e   :  { %p306_p5 = scmp.ne.s32.totalorder %s442_s4, %s305_s30  ;;  %p309_p6 = scmp.lt.u32.totalorder %s305_s30, %s442_s4 }
 0x140   :  { %p311_p7 = pnand %p309_p6, %p306_p5 }
 0x142   :  { %314 = shalt.err (!%p311_p7)
}
 0x143   :  { %179 = dma.vmem_to_hbm [thread:$0]  %s177_s26, 16, %s442_s4, [#allocation4]  }
 0x144   :  { %315 = dma.done.wait [#allocation4], 16  }
 0x145   :  { %316 = vsyncadd [#allocation4], 4294967280 }
 0x146   :  { %183 = vsyncpa [#allocation4], 1 }

</bundles_post_ra>
